<compile_context>
chip_gen: v7x
topology: tpu7x:2x2x1
jax: 0.10.0
libtpu: 0.0.40
codegen_flags: <defaults>
</compile_context>

<pallas_src>
import functools

import jax
import jax.numpy as jnp
from jax.experimental import pallas as pl
from jax.experimental.pallas import tpu as pltpu


def _round_up(n, m):
    return ((n + m - 1) // m) * m


def _fused_mlp_kernel(*refs, n_layers):
    """refs = (x, w0, b0, w1, b1, ..., w_{L-1}, b_{L-1}, out).

    Computes out = (relu(...relu(x @ w0 + b0)...) @ w_{L-1}) + b_{L-1}
    entirely in VMEM / vregs; only the final result is stored.
    Weights are bf16; matmuls accumulate in f32; bias-add / ReLU are f32.
    """
    x_ref = refs[0]
    o_ref = refs[-1]
    h = x_ref[...]
    for i in range(n_layers):
        w_ref = refs[1 + 2 * i]
        b_ref = refs[2 + 2 * i]
        h = jnp.dot(h.astype(jnp.bfloat16), w_ref[...],
                    preferred_element_type=jnp.float32) + b_ref[...]
        if i < n_layers - 1:  # ReLU after every layer except the last
            h = jnp.maximum(h, 0.0)
    o_ref[...] = h.astype(o_ref.dtype)


def prep_mlp_params(params):
    """One-time offline prep: weights -> bf16 (native MXU path, half the HBM
    bytes), biases -> (1, n) f32 rows (broadcast-add in f32 inside the kernel).
    No lane padding: intermediates never touch HBM, full blocks are exempt from
    the (8,128) rule."""
    prepped = []
    for (w, b) in params:
        prepped.append((w.astype(jnp.bfloat16),
                        b.reshape(1, -1).astype(jnp.float32)))
    return prepped


def mlp_forward(x, prepped_params):
    """Flatten NCHW input, run the whole MLP in one fused Pallas kernel."""
    B = x.shape[0]
    h = x.reshape(B, -1)  # nn.Flatten (row-major, matches torch)
    F = h.shape[1]
    n_layers = len(prepped_params)
    n_out = prepped_params[-1][0].shape[1]

    # Batch tiling: big batches get 256-row tiles (double-buffered DMA, shards
    # across v7x's 2 TensorCores); tiny batches become a single tile padded to
    # the 8-row f32 sublane so the block shape stays legal.
    tb = 256 if B >= 256 else _round_up(B, 8)
    B_pad = _round_up(B, tb)
    if B_pad != B:
        h = jnp.pad(h, ((0, B_pad - B), (0, 0)))
    grid = (B_pad // tb,)

    args = [h]
    in_specs = [pl.BlockSpec((tb, F), lambda i: (i, 0))]
    for (w, b) in prepped_params:
        args.append(w)
        args.append(b)
        # Weights/biases: same (only) block for every batch tile -> VMEM-resident.
        in_specs.append(pl.BlockSpec(w.shape, lambda i: (0, 0)))
        in_specs.append(pl.BlockSpec(b.shape, lambda i: (0, 0)))

    flops = 2 * B_pad * sum(w.shape[0] * w.shape[1] for (w, _) in prepped_params)
    bytes_accessed = (
        h.size * h.dtype.itemsize
        + sum(w.size * w.dtype.itemsize + b.size * b.dtype.itemsize
              for (w, b) in prepped_params)
        + B_pad * n_out * x.dtype.itemsize)

    kernel = functools.partial(_fused_mlp_kernel, n_layers=n_layers)
    out = pl.pallas_call(
        kernel,
        out_shape=jax.ShapeDtypeStruct((B_pad, n_out), x.dtype),
        grid=grid,
        in_specs=in_specs,
        out_specs=pl.BlockSpec((tb, n_out), lambda i: (i, 0)),
        compiler_params=pltpu.CompilerParams(
            dimension_semantics=("parallel",),
            vmem_limit_bytes=32 * 1024 * 1024),
        cost_estimate=pl.CostEstimate(
            flops=flops, transcendentals=0, bytes_accessed=bytes_accessed),
    )(*args)
    return out[:B] if B_pad != B else out


def init_mlp_params(key, layers):
    """Deterministic init mimicking nn.Linear's uniform(-1/sqrt(fan_in), ...)."""
    params = []
    for i in range(len(layers) - 1):
        fan_in, fan_out = layers[i], layers[i + 1]
        key, kw, kb = jax.random.split(key, 3)
        bound = 1.0 / jnp.sqrt(fan_in)
        w = jax.random.uniform(kw, (fan_in, fan_out), jnp.float32, -bound, bound)
        b = jax.random.uniform(kb, (fan_out,), jnp.float32, -bound, bound)
        params.append((w, b))
    return params


if __name__ == "__main__":
    key = jax.random.PRNGKey(0)
    k_in, k_params = jax.random.split(key)

    # small shapes: batch=2, channels=4, spatial=16x16 -> 1024 input features
    x = jax.random.normal(k_in, (2, 4, 16, 16), dtype=jnp.float32)
    layers = [4 * 16 * 16, 32, 32, 8]  # MLP([1024, 32, 32, 8])
    params = init_mlp_params(k_params, layers)
    prepped = prep_mlp_params(params)

    out = mlp_forward(x, prepped)
    jax.block_until_ready(out)

    # Reference with the same bf16-weight / f32-accumulate numerics (plain JAX).
    h_ref = x.reshape(x.shape[0], -1)
    for i, (w, b) in enumerate(params):
        h_ref = jnp.dot(h_ref.astype(jnp.bfloat16), w.astype(jnp.bfloat16),
                        preferred_element_type=jnp.float32) + b
        if i < len(params) - 1:
            h_ref = jnp.maximum(h_ref, 0.0)

    assert out.shape == (2, 8)
    assert jnp.allclose(out, h_ref, atol=2e-3, rtol=2e-3)

    print("KERNEL_OK")
</pallas_src>

<mosaic_0001>
module attributes {stable_mosaic.version = 11 : i64} {
  func.func @_fused_mlp_kernel(%arg0: i32, %arg1: memref<8x1024xf32, #tpu.memory_space<vmem>>, %arg2: memref<1024x32xbf16, #tpu.memory_space<vmem>>, %arg3: memref<1x32xf32, #tpu.memory_space<vmem>>, %arg4: memref<32x32xbf16, #tpu.memory_space<vmem>>, %arg5: memref<1x32xf32, #tpu.memory_space<vmem>>, %arg6: memref<32x8xbf16, #tpu.memory_space<vmem>>, %arg7: memref<1x8xf32, #tpu.memory_space<vmem>>, %arg8: memref<8x8xf32, #tpu.memory_space<vmem>>) attributes {dimension_semantics = [#tpu.dimension_semantics<parallel>], iteration_bounds = array<i64: 1>, scalar_prefetch = 0 : i64, scratch_operands = 0 : i64, tpu.core_type = #tpu.core_type<tc>, window_params = [{transform_indices = @transform_0, window_bounds = array<i64: 8, 1024>}, {pipeline_mode = #tpu.pipeline_mode<synchronous>, transform_indices = @transform_1, window_bounds = array<i64: 1024, 32>}, {pipeline_mode = #tpu.pipeline_mode<synchronous>, transform_indices = @transform_2, window_bounds = array<i64: 1, 32>}, {pipeline_mode = #tpu.pipeline_mode<synchronous>, transform_indices = @transform_3, window_bounds = array<i64: 32, 32>}, {pipeline_mode = #tpu.pipeline_mode<synchronous>, transform_indices = @transform_4, window_bounds = array<i64: 1, 32>}, {pipeline_mode = #tpu.pipeline_mode<synchronous>, transform_indices = @transform_5, window_bounds = array<i64: 32, 8>}, {pipeline_mode = #tpu.pipeline_mode<synchronous>, transform_indices = @transform_6, window_bounds = array<i64: 1, 8>}, {transform_indices = @transform_7, window_bounds = array<i64: 8, 8>}]} {
    %c0 = arith.constant 0 : index
    %c0_0 = arith.constant 0 : index
    %0 = vector.load %arg1[%c0, %c0_0] : memref<8x1024xf32, #tpu.memory_space<vmem>>, vector<8x1024xf32>
    %1 = arith.truncf %0 : vector<8x1024xf32> to vector<8x1024xbf16>
    %c0_1 = arith.constant 0 : index
    %c0_2 = arith.constant 0 : index
    %2 = vector.load %arg2[%c0_1, %c0_2] : memref<1024x32xbf16, #tpu.memory_space<vmem>>, vector<1024x32xbf16>
    %cst = arith.constant dense<0.000000e+00> : vector<8x32xf32>
    %3 = tpu.matmul %1, %2, %cst {dimension_numbers = #tpu.dot_dimension_numbers<[1], [0], [0], [1], [0, 0, 1, 1], [], []>} : vector<8x1024xbf16>, vector<1024x32xbf16>, vector<8x32xf32> -> vector<8x32xf32>
    %c0_3 = arith.constant 0 : index
    %c0_4 = arith.constant 0 : index
    %4 = vector.load %arg3[%c0_3, %c0_4] : memref<1x32xf32, #tpu.memory_space<vmem>>, vector<1x32xf32>
    %5 = vector.broadcast %4 : vector<1x32xf32> to vector<8x32xf32>
    %6 = arith.addf %3, %5 : vector<8x32xf32>
    %cst_5 = arith.constant 0.000000e+00 : f32
    %7 = vector.broadcast %cst_5 : f32 to vector<8x32xf32>
    %8 = arith.maximumf %6, %7 : vector<8x32xf32>
    %9 = arith.truncf %8 : vector<8x32xf32> to vector<8x32xbf16>
    %c0_6 = arith.constant 0 : index
    %c0_7 = arith.constant 0 : index
    %10 = vector.load %arg4[%c0_6, %c0_7] : memref<32x32xbf16, #tpu.memory_space<vmem>>, vector<32x32xbf16>
    %cst_8 = arith.constant dense<0.000000e+00> : vector<8x32xf32>
    %11 = tpu.matmul %9, %10, %cst_8 {dimension_numbers = #tpu.dot_dimension_numbers<[1], [0], [0], [1], [0, 0, 1, 1], [], []>} : vector<8x32xbf16>, vector<32x32xbf16>, vector<8x32xf32> -> vector<8x32xf32>
    %c0_9 = arith.constant 0 : index
    %c0_10 = arith.constant 0 : index
    %12 = vector.load %arg5[%c0_9, %c0_10] : memref<1x32xf32, #tpu.memory_space<vmem>>, vector<1x32xf32>
    %13 = vector.broadcast %12 : vector<1x32xf32> to vector<8x32xf32>
    %14 = arith.addf %11, %13 : vector<8x32xf32>
    %cst_11 = arith.constant 0.000000e+00 : f32
    %15 = vector.broadcast %cst_11 : f32 to vector<8x32xf32>
    %16 = arith.maximumf %14, %15 : vector<8x32xf32>
    %17 = arith.truncf %16 : vector<8x32xf32> to vector<8x32xbf16>
    %c0_12 = arith.constant 0 : index
    %c0_13 = arith.constant 0 : index
    %18 = vector.load %arg6[%c0_12, %c0_13] : memref<32x8xbf16, #tpu.memory_space<vmem>>, vector<32x8xbf16>
    %cst_14 = arith.constant dense<0.000000e+00> : vector<8x8xf32>
    %19 = tpu.matmul %17, %18, %cst_14 {dimension_numbers = #tpu.dot_dimension_numbers<[1], [0], [0], [1], [0, 0, 1, 1], [], []>} : vector<8x32xbf16>, vector<32x8xbf16>, vector<8x8xf32> -> vector<8x8xf32>
    %c0_15 = arith.constant 0 : index
    %c0_16 = arith.constant 0 : index
    %20 = vector.load %arg7[%c0_15, %c0_16] : memref<1x8xf32, #tpu.memory_space<vmem>>, vector<1x8xf32>
    %21 = vector.broadcast %20 : vector<1x8xf32> to vector<8x8xf32>
    %22 = arith.addf %19, %21 : vector<8x8xf32>
    %c0_17 = arith.constant 0 : index
    %c0_18 = arith.constant 0 : index
    %23 = vector.load %arg8[%c0_17, %c0_18] : memref<8x8xf32, #tpu.memory_space<vmem>>, vector<8x8xf32>
    tpu.vector_store %arg8[%c0_17, %c0_18], %22 {strides = array<i32>} : memref<8x8xf32, #tpu.memory_space<vmem>>, vector<8x8xf32>,
    return
  }
  func.func @transform_0(%arg0: i32) -> (i32, i32) {
    %c0_i32 = arith.constant 0 : i32
    %c0_i32_0 = arith.constant 0 : i32
    return %arg0, %c0_i32 : i32, i32
  }
  func.func @transform_1(%arg0: i32) -> (i32, i32) {
    %c0_i32 = arith.constant 0 : i32
    %c0_i32_0 = arith.constant 0 : i32
    %c0_i32_1 = arith.constant 0 : i32
    return %c0_i32, %c0_i32_0 : i32, i32
  }
  func.func @transform_2(%arg0: i32) -> (i32, i32) {
    %c0_i32 = arith.constant 0 : i32
    %c0_i32_0 = arith.constant 0 : i32
    %c0_i32_1 = arith.constant 0 : i32
    return %c0_i32, %c0_i32_0 : i32, i32
  }
  func.func @transform_3(%arg0: i32) -> (i32, i32) {
    %c0_i32 = arith.constant 0 : i32
    %c0_i32_0 = arith.constant 0 : i32
    %c0_i32_1 = arith.constant 0 : i32
    return %c0_i32, %c0_i32_0 : i32, i32
  }
  func.func @transform_4(%arg0: i32) -> (i32, i32) {
    %c0_i32 = arith.constant 0 : i32
    %c0_i32_0 = arith.constant 0 : i32
    %c0_i32_1 = arith.constant 0 : i32
    return %c0_i32, %c0_i32_0 : i32, i32
  }
  func.func @transform_5(%arg0: i32) -> (i32, i32) {
    %c0_i32 = arith.constant 0 : i32
    %c0_i32_0 = arith.constant 0 : i32
    %c0_i32_1 = arith.constant 0 : i32
    return %c0_i32, %c0_i32_0 : i32, i32
  }
  func.func @transform_6(%arg0: i32) -> (i32, i32) {
    %c0_i32 = arith.constant 0 : i32
    %c0_i32_0 = arith.constant 0 : i32
    %c0_i32_1 = arith.constant 0 : i32
    return %c0_i32, %c0_i32_0 : i32, i32
  }
  func.func @transform_7(%arg0: i32) -> (i32, i32) {
    %c0_i32 = arith.constant 0 : i32
    %c0_i32_0 = arith.constant 0 : i32
    return %arg0, %c0_i32 : i32, i32
  }
}

</mosaic_0001>

<bundles_post_ra>
// kernel: tpu_custom_call.1
= control target key start
LH: loop header
LB: loop body
LE: loop exit
PB: predicated region body
PF: predicated region fallthrough
CT: control target
= control target key end

     0   :  { %s1446_s0 = inlined_call_operand.vmem [shape: f32[8,1024], index: 0, kind: input, shape index: {}]   ;;  %s1447_s1 = inlined_call_operand.vmem [shape: bf16[1024,32], index: 1, kind: input, shape index: {}]   ;;  %s1448_s2 = inlined_call_operand.vmem [shape: f32[1,32], index: 2, kind: input, shape index: {}]   ;;  %s1449_s3 = inlined_call_operand.vmem [shape: bf16[32,32], index: 3, kind: input, shape index: {}]   ;;  %s1450_s4 = inlined_call_operand.vmem [shape: f32[1,32], index: 4, kind: input, shape index: {}]   ;;  %s1451_s5 = inlined_call_operand.vmem [shape: bf16[32,8], index: 5, kind: input, shape index: {}]   ;;  %s1452_s6 = inlined_call_operand.vmem [shape: f32[1,8], index: 6, kind: input, shape index: {}]   ;;  %s1453_s7 = inlined_call_operand.hbm [shape: f32[8,8], index: 7, kind: output, shape index: {}]  }
   0x1   :  { %v1062_v0 = vld [vmem:[%s1447_s1 + $0x40] sm:$0xff]   ;;  %v1066_v4 = vld [vmem:[%s1447_s1 + $0x48] sm:$0xff]   ;;  %v1070_v8 = vld [vmem:[%s1447_s1 + $0x50] sm:$0xff]  }
   0x2   :  { %v1063_v1 = vld [vmem:[%s1447_s1 + $0xc0] sm:$0xff]   ;;  %949 = vmatprep.subr.bf16.mxu0 %v1062_v0  ;;  %v1067_v5 = vld [vmem:[%s1447_s1 + $0xc8] sm:$0xff]   ;;  %v1071_v9 = vld [vmem:[%s1447_s1 + $0xd0] sm:$0xff]  }
   0x3   :  { %v1064_v2 = vld [vmem:[%s1447_s1] sm:$0xff]   ;;  %971 = vmatprep.subr.bf16.mxu1 %v1063_v1  ;;  %v1068_v6 = vld [vmem:[%s1447_s1 + $0x8] sm:$0xff]   ;;  %v1072_v10 = vld [vmem:[%s1447_s1 + $0x10] sm:$0xff]  }
   0x4   :  { %v1065_v3 = vld [vmem:[%s1447_s1 + $0x80] sm:$0xff]   ;;  %950 = vmatpush3.bf16.msra.mxu0 %v1064_v2  ;;  %v1069_v7 = vld [vmem:[%s1447_s1 + $0x88] sm:$0xff]   ;;  %v1073_v11 = vld [vmem:[%s1447_s1 + $0x90] sm:$0xff]  }
   0x5   :  { %972 = vmatpush3.bf16.msra.mxu1 %v1065_v3  ;;  %951 = vmatprep.subr.bf16.mxu0 %v1066_v4  ;;  %v1074_v12 = vld [vmem:[%s1447_s1 + $0x58] sm:$0xff]   ;;  %v1078_v16 = vld [vmem:[%s1447_s1 + $0x60] sm:$0xff]   ;;  %v1082_v20 = vld [vmem:[%s1447_s1 + $0x68] sm:$0xff]  }
   0x6   :  { %973 = vmatprep.subr.bf16.mxu1 %v1067_v5  ;;  %v1075_v13 = vld [vmem:[%s1447_s1 + $0xd8] sm:$0xff]   ;;  %v1079_v17 = vld [vmem:[%s1447_s1 + $0xe0] sm:$0xff]   ;;  %v1083_v21 = vld [vmem:[%s1447_s1 + $0xe8] sm:$0xff]  }
   0x7   :  { %v1076_v14 = vld [vmem:[%s1447_s1 + $0x18] sm:$0xff]   ;;  %v1080_v18 = vld [vmem:[%s1447_s1 + $0x20] sm:$0xff]   ;;  %v1084_v22 = vld [vmem:[%s1447_s1 + $0x28] sm:$0xff]  }
   0x8   :  { %952 = vmatpush3.bf16.msra.mxu0 %v1068_v6  ;;  %v1077_v15 = vld [vmem:[%s1447_s1 + $0x98] sm:$0xff]   ;;  %v1081_v19 = vld [vmem:[%s1447_s1 + $0xa0] sm:$0xff]   ;;  %v1085_v23 = vld [vmem:[%s1447_s1 + $0xa8] sm:$0xff]  }
   0x9   :  { %974 = vmatpush3.bf16.msra.mxu1 %v1069_v7  ;;  %953 = vmatprep.subr.bf16.mxu0 %v1070_v8  ;;  %v1086_v24 = vld [vmem:[%s1447_s1 + $0x70] sm:$0xff]   ;;  %v1090_v28 = vld [vmem:[%s1447_s1 + $0x78] sm:$0xff]   ;;  %v29_v32 = vld [vmem:[%s1446_s0 + $0x8] sm:$0xff] }
   0xa   :  { %975 = vmatprep.subr.bf16.mxu1 %v1071_v9  ;;  %v1087_v25 = vld [vmem:[%s1447_s1 + $0xf0] sm:$0xff]   ;;  %v1091_v29 = vld [vmem:[%s1447_s1 + $0xf8] sm:$0xff]   ;;  %v28_v34 = vld [vmem:[%s1446_s0] sm:$0xff]  ;;  %v37_v35 = vpack.c.bf16 %v29_v32, %v29_v32 }
   0xb   :  { %v1088_v26 = vld [vmem:[%s1447_s1 + $0x30] sm:$0xff]   ;;  %v1092_v30 = vld [vmem:[%s1447_s1 + $0x38] sm:$0xff]   ;;  %v36_v37 = vpack.c.bf16 %v28_v34, %v28_v34  ;;  %v1094_v40 = vld [vmem:[%s1447_s1 + $0x140] sm:$0xff]  }
   0xc   :  { %954 = vmatpush3.bf16.msra.mxu0 %v1072_v10  ;;  %v1089_v27 = vld [vmem:[%s1447_s1 + $0xb0] sm:$0xff]   ;;  %v1093_v31 = vld [vmem:[%s1447_s1 + $0xb8] sm:$0xff]   ;;  %595 = vmatprep.mubr.bf16.mxu0 %v37_v35  ;;  %v1095_v41 = vld [vmem:[%s1447_s1 + $0x1c0] sm:$0xff]  }
   0xd   :  { %976 = vmatpush3.bf16.msra.mxu1 %v1073_v11  ;;  %955 = vmatprep.subr.bf16.mxu0 %v1074_v12  ;;  %v31_v33 = vld [vmem:[%s1446_s0 + $0x18] sm:$0xff]  ;;  %v30_v38 = vld [vmem:[%s1446_s0 + $0x10] sm:$0xff]  ;;  %v1096_v42 = vld [vmem:[%s1447_s1 + $0x100] sm:$0xff]  }
   0xe   :  { %977 = vmatprep.subr.bf16.mxu1 %v1075_v13  ;;  %v39_v36 = vpack.c.bf16 %v31_v33, %v31_v33  ;;  %v38_v39 = vpack.c.bf16 %v30_v38, %v30_v38  ;;  %v1097_v43 = vld [vmem:[%s1447_s1 + $0x180] sm:$0xff]   ;;  %v1098_v44 = vld [vmem:[%s1447_s1 + $0x148] sm:$0xff]   ;;  %v1102_v48 = vld [vmem:[%s1447_s1 + $0x150] sm:$0xff]  }
   0xf   :  { %v1099_v45 = vld [vmem:[%s1447_s1 + $0x1c8] sm:$0xff]   ;;  %v1103_v49 = vld [vmem:[%s1447_s1 + $0x1d0] sm:$0xff]   ;;  %v1106_v52 = vld [vmem:[%s1447_s1 + $0x158] sm:$0xff]  }
  0x10   :  { %956 = vmatpush3.bf16.msra.mxu0 %v1076_v14  ;;  %635 = vmatprep.mubr.bf16.mxu1 %v39_v36  ;;  %v1100_v46 = vld [vmem:[%s1447_s1 + $0x108] sm:$0xff]   ;;  %v1104_v50 = vld [vmem:[%s1447_s1 + $0x110] sm:$0xff]   ;;  %v1107_v53 = vld [vmem:[%s1447_s1 + $0x1d8] sm:$0xff]  }
  0x11   :  { %978 = vmatpush3.bf16.msra.mxu1 %v1077_v15  ;;  %957 = vmatprep.subr.bf16.mxu0 %v1078_v16  ;;  %v1101_v47 = vld [vmem:[%s1447_s1 + $0x188] sm:$0xff]   ;;  %v1105_v51 = vld [vmem:[%s1447_s1 + $0x190] sm:$0xff]   ;;  %v1108_v54 = vld [vmem:[%s1447_s1 + $0x118] sm:$0xff]  }
  0x12   :  { %979 = vmatprep.subr.bf16.mxu1 %v1079_v17  ;;  %v1109_v55 = vld [vmem:[%s1447_s1 + $0x198] sm:$0xff]   ;;  %v1110_v56 = vld [vmem:[%s1447_s1 + $0x160] sm:$0xff]   ;;  %v1114_v60 = vld [vmem:[%s1447_s1 + $0x168] sm:$0xff]  }
  0x13   :  { %v1111_v57 = vld [vmem:[%s1447_s1 + $0x1e0] sm:$0xff]   ;;  %v1115_v61 = vld [vmem:[%s1447_s1 + $0x1e8] sm:$0xff]   ;;  %v1118_v0 = vld [vmem:[%s1447_s1 + $0x170] sm:$0xff]  }
  0x14   :  { %958 = vmatpush3.bf16.msra.mxu0 %v1080_v18  ;;  %v1112_v58 = vld [vmem:[%s1447_s1 + $0x120] sm:$0xff]   ;;  %v1116_v62 = vld [vmem:[%s1447_s1 + $0x128] sm:$0xff]   ;;  %v1119_v1 = vld [vmem:[%s1447_s1 + $0x1f0] sm:$0xff]  }
  0x15   :  { %980 = vmatpush3.bf16.msra.mxu1 %v1081_v19  ;;  %959 = vmatprep.subr.bf16.mxu0 %v1082_v20  ;;  %v1113_v59 = vld [vmem:[%s1447_s1 + $0x1a0] sm:$0xff]   ;;  %v1117_v63 = vld [vmem:[%s1447_s1 + $0x1a8] sm:$0xff]   ;;  %v1120_v2 = vld [vmem:[%s1447_s1 + $0x130] sm:$0xff]  }
  0x16   :  { %981 = vmatprep.subr.bf16.mxu1 %v1083_v21  ;;  %v1121_v3 = vld [vmem:[%s1447_s1 + $0x1b0] sm:$0xff]   ;;  %v1122_v4 = vld [vmem:[%s1447_s1 + $0x178] sm:$0xff]   ;;  %v33_v8 = vld [vmem:[%s1446_s0 + $0x28] sm:$0xff] }
  0x17   :  { %v1123_v5 = vld [vmem:[%s1447_s1 + $0x1f8] sm:$0xff]   ;;  %v41_v10 = vpack.c.bf16 %v33_v8, %v33_v8  ;;  %v32_v12 = vld [vmem:[%s1446_s0 + $0x20] sm:$0xff]  ;;  %v34_v13 = vld [vmem:[%s1446_s0 + $0x30] sm:$0xff] }
  0x18   :  { %960 = vmatpush3.bf16.msra.mxu0 %v1084_v22  ;;  %v1124_v6 = vld [vmem:[%s1447_s1 + $0x138] sm:$0xff]   ;;  %v40_v14 = vpack.c.bf16 %v32_v12, %v32_v12  ;;  %v42_v15 = vpack.c.bf16 %v34_v13, %v34_v13 }
  0x19   :  { %982 = vmatpush3.bf16.msra.mxu1 %v1085_v23  ;;  %961 = vmatprep.subr.bf16.mxu0 %v1086_v24  ;;  %v1125_v7 = vld [vmem:[%s1447_s1 + $0x1b8] sm:$0xff]  }
  0x1a   :  { %983 = vmatprep.subr.bf16.mxu1 %v1087_v25  ;;  %v35_v9 = vld [vmem:[%s1446_s0 + $0x38] sm:$0xff] }
  0x1b   :  { %v43_v11 = vpack.c.bf16 %v35_v9, %v35_v9 }
  0x1c   :  { %962 = vmatpush3.bf16.msra.mxu0 %v1088_v26 }
  0x1d   :  { %984 = vmatpush3.bf16.msra.mxu1 %v1089_v27  ;;  %963 = vmatprep.subr.bf16.mxu0 %v1090_v28 }
  0x1e   :  { %985 = vmatprep.subr.bf16.mxu1 %v1091_v29 }
  0x20   :  { %964 = vmatpush3.bf16.msra.mxu0 %v1092_v30 }
  0x21   :  { %986 = vmatpush3.bf16.msra.mxu1 %v1093_v31  ;;  %993 = vmatprep.subr.bf16.mxu0 %v1094_v40 }
  0x22   :  { %1015 = vmatprep.subr.bf16.mxu1 %v1095_v41 }
  0x23   :  { %596 = vmatmul.mubr.bf16.vlgmr.msra.gmra.mrb[0].mxu0 %v36_v37 }
  0x24   :  { %636 = vmatmul.mubr.bf16.vlgmr.msra.gmra.mrb[0].mxu1 %v38_v39  ;;  %994 = vmatpush3.bf16.msra.mxu0 %v1096_v42 }
  0x25   :  { %1016 = vmatpush3.bf16.msra.mxu1 %v1097_v43  ;;  %995 = vmatprep.subr.bf16.mxu0 %v1098_v44 }
  0x26   :  { %1017 = vmatprep.subr.bf16.mxu1 %v1099_v45  ;;  %675 = vmatprep.mubr.bf16.mxu0 %v41_v10 }
  0x27   :  { %715 = vmatprep.mubr.bf16.mxu1 %v43_v11 }
  0x28   :  { %996 = vmatpush3.bf16.msra.mxu0 %v1100_v46 }
  0x29   :  { %1018 = vmatpush3.bf16.msra.mxu1 %v1101_v47  ;;  %997 = vmatprep.subr.bf16.mxu0 %v1102_v48 }
  0x2a   :  { %1019 = vmatprep.subr.bf16.mxu1 %v1103_v49 }
  0x2c   :  { %998 = vmatpush3.bf16.msra.mxu0 %v1104_v50 }
  0x2d   :  { %1020 = vmatpush3.bf16.msra.mxu1 %v1105_v51  ;;  %999 = vmatprep.subr.bf16.mxu0 %v1106_v52 }
  0x2e   :  { %1021 = vmatprep.subr.bf16.mxu1 %v1107_v53 }
  0x30   :  { %1000 = vmatpush3.bf16.msra.mxu0 %v1108_v54 }
  0x31   :  { %1022 = vmatpush3.bf16.msra.mxu1 %v1109_v55  ;;  %1001 = vmatprep.subr.bf16.mxu0 %v1110_v56 }
  0x32   :  { %1023 = vmatprep.subr.bf16.mxu1 %v1111_v57 }
  0x34   :  { %1002 = vmatpush3.bf16.msra.mxu0 %v1112_v58 }
  0x35   :  { %1024 = vmatpush3.bf16.msra.mxu1 %v1113_v59  ;;  %1003 = vmatprep.subr.bf16.mxu0 %v1114_v60 }
  0x36   :  { %1025 = vmatprep.subr.bf16.mxu1 %v1115_v61 }
  0x38   :  { %1004 = vmatpush3.bf16.msra.mxu0 %v1116_v62 }
  0x39   :  { %1026 = vmatpush3.bf16.msra.mxu1 %v1117_v63  ;;  %1005 = vmatprep.subr.bf16.mxu0 %v1118_v0 }
  0x3a   :  { %1027 = vmatprep.subr.bf16.mxu1 %v1119_v1 }
  0x3c   :  { %1006 = vmatpush3.bf16.msra.mxu0 %v1120_v2 }
  0x3d   :  { %1028 = vmatpush3.bf16.msra.mxu1 %v1121_v3  ;;  %1007 = vmatprep.subr.bf16.mxu0 %v1122_v4 }
  0x3e   :  { %1029 = vmatprep.subr.bf16.mxu1 %v1123_v5 }
  0x40   :  { %1008 = vmatpush3.bf16.msra.mxu0 %v1124_v6 }
  0x41   :  { %1030 = vmatpush3.bf16.msra.mxu1 %v1125_v7 }
  0x43   :  { %676 = vmatmul.mubr.bf16.vlgmr.msra.gmra.mrb[4].mxu0 %v40_v14 }
  0x44   :  { %12 = vsyncpa [#allocation3], 0  ;;  %716 = vmatmul.mubr.bf16.vlgmr.msra.gmra.mrb[4].mxu1 %v42_v15  ;;  %v1126_v16 = vld [vmem:[%s1449_s3] sm:$0xff]   ;;  %v1154_v17 = vmov 0.0   ;;  %v1127_v18 = vld [vmem:[%s1449_s3 + $0x8] sm:$0xff]   ;;  %vm1155_vm0 = vmmov 0  }
  0x45   :  { %1043 = vmatprep.subr.bf16.mxu0 %v1154_v17  ;;  %1051 = vmatprep.subr.bf16.mxu1 %v1154_v17  ;;  %v1128_v19 = vld [vmem:[%s1451_s5] sm:$0xff]   ;;  %vm748_vm1 = vcmask 261120   ;;  %v1129_v47 = vld [vmem:[%s1451_s5 + $0x8] sm:$0xff]   ;;  %s1156_s17 = smov [#allocation2]   ;;  %vm860_vm2 = vcmask 64512  }
  0x46   :  { %1044 = vmatpush3.bf16.msra.mxu0 %v1126_v16  ;;  %1047 = vmatprep.mubr.msk.bf16.mxu0 %vm1155_vm0, %v1154_v17  ;;  %v876_v22 = vld [vmem:[%s1448_s2] ss:$0 sm:$0xff]  ;;  %s868_s18 = sshll.u32 %s1156_s17, 4  ;;  %s869_s18 = int_to_ptr.vmem [resolvable:$true] %s868_s18 }
  0x47   :  { %1045 = vmatprep.subr.bf16.mxu0 %v1154_v17  ;;  %1055 = vmatprep.mubr.msk.bf16.mxu1 %vm1155_vm0, %v1154_v17  ;;  %v941_v48 = vld [vmem:[%s1450_s4] ss:$0 sm:$0xff]  ;;  %s1130_s4 = scalar_lea.vmem %s869_s18, 128  ;;  %p1135_p1 = scmp.lt.s32.totalorder %s869_s18, %s869_s18 }
  0x48   :  { %1052 = vmatpush3.bf16.msra.mxu1 %v1128_v19  ;;  %v945_v56 = vld [vmem:[%s1452_s6] ss:$0 sm:$0xff]  ;;  %p1131_p0 = scmp.ne.s32.totalorder %s869_s18, %s1130_s4  ;;  %p1136_p2 = scmp.lt.s32.totalorder %s1130_s4, %s1130_s4 }
  0x49   :  { %1053 = vmatprep.subr.bf16.mxu1 %v1154_v17 }
  0x4a   :  { %1046 = vmatpush3.bf16.msra.mxu0 %v1127_v18  ;;  %p1137_p3 = por %p1136_p2, %p1135_p1 }
  0x4c   :  { %1054 = vmatpush3.bf16.msra.mxu1 %v1129_v47  ;;  %p1138_p4 = pnand %p1137_p3, %p1131_p0 }
  0xf6   :  { %v965_v20 = vpop.f32.mrb[0].mxu0 }
  0xf7   :  { %v987_v21 = vpop.f32.mrb[0].mxu1  ;;  %v966_v23 = vpop.f32.mrb[1].mxu0 }
  0xf8   :  { %v988_v24 = vpop.f32.mrb[1].mxu1  ;;  %v967_v25 = vadd.f32 %v966_v23, %v965_v20  ;;  %v968_v27 = vpop.f32.mrb[2].mxu0 }
  0xf9   :  { %v989_v26 = vadd.f32 %v988_v24, %v987_v21  ;;  %v990_v28 = vpop.f32.mrb[2].mxu1  ;;  %v969_v29 = vpop.f32.mrb[3].mxu0 }
  0xfa   :  { %v991_v30 = vpop.f32.mrb[3].mxu1  ;;  %v598_v31 = vadd.f32 %v967_v25, %v876_v22 }
  0xfc   :  { %v638_v32 = vadd.f32 %v989_v26, %v598_v31 }
 0x116   :  { %v1009_v33 = vpop.f32.mrb[4].mxu0 }
 0x117   :  { %v1031_v34 = vpop.f32.mrb[4].mxu1  ;;  %v1010_v35 = vpop.f32.mrb[5].mxu0 }
 0x118   :  { %v1011_v36 = vadd.f32 %v1010_v35, %v1009_v33  ;;  %v1032_v37 = vpop.f32.mrb[5].mxu1  ;;  %v1012_v38 = vpop.f32.mrb[6].mxu0 }
 0x119   :  { %v1033_v39 = vadd.f32 %v1032_v37, %v1031_v34  ;;  %v1034_v40 = vpop.f32.mrb[6].mxu1  ;;  %v1013_v41 = vpop.f32.mrb[7].mxu0 }
 0x11a   :  { %v678_v42 = vadd.f32 %v1011_v36, %v638_v32  ;;  %v1035_v43 = vpop.f32.mrb[7].mxu1 }
 0x11c   :  { %v718_v44 = vadd.f32 %v1033_v39, %v678_v42 }
 0x11e   :  { %v723_v45 = vmax.f32 %v718_v44, 0.0 }
 0x120   :  { %v724_v46 = vpack.c.bf16 %v723_v45, %v723_v45 }
 0x122   :  { %1048 = vmatmul.mubr.msk.bf16.vlgmr.msra.gmra.mrb[8].mxu0 %vm748_vm1, %v724_v46 }
 0x1f5   :  { %v786_v49 = vpop.f32.mrb[8].mxu0 }
 0x1f6   :  { %v787_v50 = vadd.f32 %v941_v48, %v786_v49  ;;  %v1049_v51 = vpop.f32.mrb[9].mxu0 }
 0x1f7   :  { %v789_v52 = vpop.f32.mrb[10].mxu0 }
 0x1f8   :  { %v792_v53 = vmax.f32 %v787_v50, 0.0  ;;  %v1050_v54 = vpop.f32.mrb[11].mxu0 }
 0x1fa   :  { %v793_v55 = vpack.c.bf16 %v792_v53, %v792_v53 }
 0x1fc   :  { %1056 = vmatmul.mubr.msk.bf16.vlgmr.msra.gmra.mrb[8].mxu1 %vm748_vm1, %v793_v55 }
 0x2cf   :  { %v854_v57 = vpop.f32.mrb[8].mxu1 }
 0x2d0   :  { %v855_v58 = vadd.f32 %v945_v56, %v854_v57  ;;  %v1057_v59 = vpop.f32.mrb[9].mxu1 }
 0x2d1   :  { %v857_v60 = vpop.f32.mrb[10].mxu1 }
 0x2d2   :  { %v1058_v61 = vpop.f32.mrb[11].mxu1  ;;  %861 = vst.msk [vmem:[#allocation2] sm:$0xff] %vm860_vm2, %v855_v58 }
 0x2d3   :  { %1141 = shalt.err (!%p1138_p4)
}
 0x2d4   :  { %s1142_s6 = scalar_lea.hbm %s1453_s7, 128 }
 0x2d5   :  { %p1143_p5 = scmp.ne.s32.totalorder %s1453_s7, %s1142_s6  ;;  %p1146_p6 = scmp.lt.u32.totalorder %s1142_s6, %s1453_s7 }
 0x2d7   :  { %p1148_p7 = pnand %p1146_p6, %p1143_p5 }
 0x2d9   :  { %1151 = shalt.err (!%p1148_p7)
}
 0x2da   :  { %871 = dma.vmem_to_hbm [thread:$0]  %s869_s18, 128, %s1453_s7, [#allocation3]  }
 0x2db   :  { %1152 = dma.done.wait [#allocation3], 128  }
 0x2dc   :  { %1153 = vsyncadd [#allocation3], 4294967168 }
 0x2dd   :  { %875 = vsyncpa [#allocation3], 1 }

</bundles_post_ra>
